<compile_context>
chip_gen: v7x
topology: tpu7x:2x2x1
jax: 0.10.0
libtpu: 0.0.40
codegen_flags: <defaults>
</compile_context>

<pallas_src>
import numpy as np
import jax
import jax.numpy as jnp
from jax.experimental import pallas as pl
from jax.experimental.pallas import tpu as pltpu


_COMPUTE_DTYPE = jnp.bfloat16                 # MXU-native; accumulation is f32
_KRON_VMEM_BUDGET_BYTES = 4 * 1024 * 1024     # single-buffer operator budget
                                              # (pipeline double-buffers -> x2)


def _bilinear_interp_matrix(in_size, out_size):
    """(out_size, in_size) matrix matching torch.nn.Upsample(mode='bilinear',
    align_corners=False) along one spatial axis: out = A @ in."""
    dst = np.arange(out_size)
    src = (dst + 0.5) * (in_size / out_size) - 0.5
    src = np.maximum(src, 0.0)
    lo = np.minimum(np.floor(src).astype(np.int64), in_size - 1)
    hi = np.minimum(lo + 1, in_size - 1)
    frac = src - lo
    a = np.zeros((out_size, in_size), dtype=np.float64)
    a[dst, lo] += 1.0 - frac
    a[dst, hi] += frac
    return a


# ---------------------------------------------------------------------------
# Fused path: conv1x1 + 2x bilinear upsample as two lane-dense MXU matmuls.
# ---------------------------------------------------------------------------
def _up_block_kron_kernel(x_ref, w_ref, a_ref, o_ref):
    # f32 in VMEM; cast to bf16 on the VPU right before the MXU (no extra
    # wrapper-side HBM pass for the cast).
    x = x_ref[0].astype(_COMPUTE_DTYPE)      # (C, H*W)      lane-dense
    w = w_ref[...].astype(_COMPUTE_DTYPE)    # (C, C)
    a = a_ref[...]                           # (H*W, OH*OW)  bf16, kron(Ah,Aw)^T

    # 1x1 conv == channel-mixing matmul (f32 accumulation on the MXU).
    y = jnp.dot(w, x, preferred_element_type=jnp.float32)               # (C, H*W)
    # bilinear 2x upsample: one deep contraction, lane-dense output.
    z = jnp.dot(y.astype(a.dtype), a, preferred_element_type=jnp.float32)
    o_ref[0] = z.astype(o_ref.dtype)                                     # (C, OH*OW)


# ---------------------------------------------------------------------------
# Separable fallback (large spatial, where kron(A_h, A_w) would not fit VMEM).
# ---------------------------------------------------------------------------
def _up_block_sep_kernel(x_ref, w_ref, ah_ref, aw_t_ref, o_ref):
    x = x_ref[0].astype(_COMPUTE_DTYPE)        # (C, H, W)
    w = w_ref[...].astype(_COMPUTE_DTYPE)      # (C, C)
    ah = ah_ref[...]                           # (OH, H)  bf16
    aw_t = aw_t_ref[...]                       # (W, OW)  bf16, pre-transposed

    y = jnp.einsum('oc,chw->ohw', w, x, preferred_element_type=jnp.float32)
    yb = y.astype(_COMPUTE_DTYPE)
    # Column interp first: contraction over the last dim of yb against the
    # leading dim of the pre-transposed matrix (plain matmul, output arrives
    # naturally in (C, H, OW) order -> no in-kernel relayout of the big buffer).
    t = jnp.einsum('chw,wj->chj', yb, aw_t, preferred_element_type=jnp.float32)
    # Row interp (contraction over H).
    z = jnp.einsum('oh,chj->coj', ah, t.astype(_COMPUTE_DTYPE),
                   preferred_element_type=jnp.float32)                   # (C, OH, OW)
    o_ref[0] = z.astype(o_ref.dtype)


def up_block(x, w, *, force_separable=False):
    """One `Up` block: Conv2d(C, C, 1, bias=False) -> bilinear 2x upsample
    (align_corners=False).  x: (N, C, H, W) float32, w: (C, C) float32."""
    N, C, H, W = x.shape
    OH, OW = 2 * H, 2 * W
    ah = _bilinear_interp_matrix(H, OH)      # (OH, H)
    aw = _bilinear_interp_matrix(W, OW)      # (OW, W)

    kron_bytes = (H * W) * (OH * OW) * 2     # bf16
    use_kron = (not force_separable) and (kron_bytes <= _KRON_VMEM_BUDGET_BYTES)

    if use_kron:
        a_t = jnp.asarray(np.kron(ah, aw).T.astype(np.float32), _COMPUTE_DTYPE)
        x_flat = x.reshape(N, C, H * W)      # metadata-only reshape in HBM
        out = pl.pallas_call(
            _up_block_kron_kernel,
            out_shape=jax.ShapeDtypeStruct((N, C, OH * OW), x.dtype),
            grid=(N,),
            in_specs=[
                pl.BlockSpec((1, C, H * W), lambda n: (n, 0, 0)),
                pl.BlockSpec((C, C), lambda n: (0, 0)),
                pl.BlockSpec((H * W, OH * OW), lambda n: (0, 0)),
            ],
            out_specs=pl.BlockSpec((1, C, OH * OW), lambda n: (n, 0, 0)),
            compiler_params=pltpu.CompilerParams(
                dimension_semantics=("parallel",)),
        )(x_flat, w, a_t)
        return out.reshape(N, C, OH, OW)

    # Separable fallback (two shallower matmuls, operators stay tiny).
    ah_c = jnp.asarray(ah.astype(np.float32), _COMPUTE_DTYPE)
    aw_t_c = jnp.asarray(aw.T.astype(np.float32), _COMPUTE_DTYPE)
    return pl.pallas_call(
        _up_block_sep_kernel,
        out_shape=jax.ShapeDtypeStruct((N, C, OH, OW), x.dtype),
        grid=(N,),
        in_specs=[
            pl.BlockSpec((1, C, H, W), lambda n: (n, 0, 0, 0)),
            pl.BlockSpec((C, C), lambda n: (0, 0)),
            pl.BlockSpec((OH, H), lambda n: (0, 0)),
            pl.BlockSpec((W, OW), lambda n: (0, 0)),
        ],
        out_specs=pl.BlockSpec((1, C, OH, OW), lambda n: (n, 0, 0, 0)),
        compiler_params=pltpu.CompilerParams(
            dimension_semantics=("parallel",)),
    )(x, w, ah_c, aw_t_c)


class UpSamplePallas:
    """Pallas equivalent of the PyTorch `UpSample` module (forward pass)."""

    def __init__(self, in_channels, scale_factor, chan_factor=2, key=None):
        self.num_blocks = int(np.log2(scale_factor))
        if key is None:
            key = jax.random.PRNGKey(0)
        keys = jax.random.split(key, max(self.num_blocks, 1))
        self.weights = []
        c = in_channels
        for i in range(self.num_blocks):
            # Conv2d(c, c, 1, bias=False) default init: U(-1/sqrt(fan_in), +).
            bound = 1.0 / np.sqrt(c)
            w = jax.random.uniform(keys[i], (c, c), jnp.float32, -bound, bound)
            self.weights.append(w)
            c = int(c // chan_factor)
        # TODO(synk): for scale_factor > 2 the reference PyTorch module has a
        # channel-count mismatch between consecutive Up blocks (each Up keeps
        # channels constant while the loop halves in_channels), so it fails at
        # runtime there too; semantics match for scale_factor == 2.
        # TODO(synk): when num_blocks > 1, fuse consecutive Up blocks into one
        # pallas_call (keep the intermediate in VMEM scratch) to avoid the HBM
        # round-trip of the 4x-larger intermediate.

    def __call__(self, x):
        for w in self.weights:
            x = up_block(x, w)
        return x


if __name__ == "__main__":
    key = jax.random.PRNGKey(0)
    k_x, k_m = jax.random.split(key)

    N, C, H, W = 2, 4, 16, 16
    x = jax.random.normal(k_x, (N, C, H, W), dtype=jnp.float32)

    model = UpSamplePallas(in_channels=C, scale_factor=2, key=k_m)
    y = jax.block_until_ready(model(x))
    assert y.shape == (N, C, 2 * H, 2 * W), y.shape
    assert y.dtype == jnp.float32

    # Pure-JAX reference on the same bf16-rounded operands (the only intended
    # deviation from the f32 PyTorch reference is the documented in-kernel
    # bf16 cast of inputs/weights before the MXU, ~1e-2 relative).
    w0 = model.weights[0]
    x_b = x.astype(_COMPUTE_DTYPE).astype(jnp.float32)
    w_b = w0.astype(_COMPUTE_DTYPE).astype(jnp.float32)
    ah = jnp.asarray(_bilinear_interp_matrix(H, 2 * H), jnp.float32)
    aw = jnp.asarray(_bilinear_interp_matrix(W, 2 * W), jnp.float32)
    y_conv = jnp.einsum('oc,nchw->nohw', w_b, x_b)
    y_conv = y_conv.astype(_COMPUTE_DTYPE).astype(jnp.float32)
    ref = jnp.einsum('ih,nchw,jw->ncij', ah, y_conv, aw)
    np.testing.assert_allclose(np.asarray(y), np.asarray(ref),
                               rtol=5e-2, atol=5e-2)

    # Exercise + validate the separable fallback path as well.
    y_sep = jax.block_until_ready(up_block(x, w0, force_separable=True))
    np.testing.assert_allclose(np.asarray(y_sep), np.asarray(ref),
                               rtol=5e-2, atol=5e-2)

    print("KERNEL_OK")
</pallas_src>

<mosaic_0001>
module attributes {stable_mosaic.version = 11 : i64} {
  func.func @_up_block_kron_kernel(%arg0: i32, %arg1: memref<1x4x256xf32, #tpu.memory_space<vmem>>, %arg2: memref<4x4xf32, #tpu.memory_space<vmem>>, %arg3: memref<256x1024xbf16, #tpu.memory_space<vmem>>, %arg4: memref<1x4x1024xf32, #tpu.memory_space<vmem>>) attributes {dimension_semantics = [#tpu.dimension_semantics<parallel>], iteration_bounds = array<i64: 2>, scalar_prefetch = 0 : i64, scratch_operands = 0 : i64, tpu.core_type = #tpu.core_type<tc>, window_params = [{transform_indices = @transform_0, window_bounds = array<i64: 1, 4, 256>}, {pipeline_mode = #tpu.pipeline_mode<synchronous>, transform_indices = @transform_1, window_bounds = array<i64: 4, 4>}, {pipeline_mode = #tpu.pipeline_mode<synchronous>, transform_indices = @transform_2, window_bounds = array<i64: 256, 1024>}, {transform_indices = @transform_3, window_bounds = array<i64: 1, 4, 1024>}]} {
    %c0 = arith.constant 0 : index
    %c0_0 = arith.constant 0 : index
    %c0_1 = arith.constant 0 : index
    %0 = vector.load %arg1[%c0, %c0_0, %c0_1] : memref<1x4x256xf32, #tpu.memory_space<vmem>>, vector<1x4x256xf32>
    %1 = vector.shape_cast %0 : vector<1x4x256xf32> to vector<4x256xf32>
    %2 = arith.truncf %1 : vector<4x256xf32> to vector<4x256xbf16>
    %c0_2 = arith.constant 0 : index
    %c0_3 = arith.constant 0 : index
    %3 = vector.load %arg2[%c0_2, %c0_3] : memref<4x4xf32, #tpu.memory_space<vmem>>, vector<4x4xf32>
    %4 = arith.truncf %3 : vector<4x4xf32> to vector<4x4xbf16>
    %c0_4 = arith.constant 0 : index
    %c0_5 = arith.constant 0 : index
    %5 = vector.load %arg3[%c0_4, %c0_5] : memref<256x1024xbf16, #tpu.memory_space<vmem>>, vector<256x1024xbf16>
    %cst = arith.constant dense<0.000000e+00> : vector<4x256xf32>
    %6 = tpu.matmul %4, %2, %cst {dimension_numbers = #tpu.dot_dimension_numbers<[1], [0], [0], [1], [0, 0, 1, 1], [], []>} : vector<4x4xbf16>, vector<4x256xbf16>, vector<4x256xf32> -> vector<4x256xf32>
    %7 = arith.truncf %6 : vector<4x256xf32> to vector<4x256xbf16>
    %cst_6 = arith.constant dense<0.000000e+00> : vector<4x1024xf32>
    %8 = tpu.matmul %7, %5, %cst_6 {dimension_numbers = #tpu.dot_dimension_numbers<[1], [0], [0], [1], [0, 0, 1, 1], [], []>} : vector<4x256xbf16>, vector<256x1024xbf16>, vector<4x1024xf32> -> vector<4x1024xf32>
    %c0_7 = arith.constant 0 : index
    %c0_8 = arith.constant 0 : index
    %c0_9 = arith.constant 0 : index
    %9 = vector.load %arg4[%c0_7, %c0_8, %c0_9] : memref<1x4x1024xf32, #tpu.memory_space<vmem>>, vector<1x4x1024xf32>
    %10 = vector.shape_cast %9 : vector<1x4x1024xf32> to vector<4x1024xf32>
    %11 = vector.shape_cast %8 : vector<4x1024xf32> to vector<1x4x1024xf32>
    tpu.vector_store %arg4[%c0_7, %c0_8, %c0_9], %11 {strides = array<i32>} : memref<1x4x1024xf32, #tpu.memory_space<vmem>>, vector<1x4x1024xf32>,
    return
  }
  func.func @transform_0(%arg0: i32) -> (i32, i32, i32) {
    %c0_i32 = arith.constant 0 : i32
    %c0_i32_0 = arith.constant 0 : i32
    %c0_i32_1 = arith.constant 0 : i32
    return %arg0, %c0_i32, %c0_i32_0 : i32, i32, i32
  }
  func.func @transform_1(%arg0: i32) -> (i32, i32) {
    %c0_i32 = arith.constant 0 : i32
    %c0_i32_0 = arith.constant 0 : i32
    %c0_i32_1 = arith.constant 0 : i32
    return %c0_i32, %c0_i32_0 : i32, i32
  }
  func.func @transform_2(%arg0: i32) -> (i32, i32) {
    %c0_i32 = arith.constant 0 : i32
    %c0_i32_0 = arith.constant 0 : i32
    %c0_i32_1 = arith.constant 0 : i32
    return %c0_i32, %c0_i32_0 : i32, i32
  }
  func.func @transform_3(%arg0: i32) -> (i32, i32, i32) {
    %c0_i32 = arith.constant 0 : i32
    %c0_i32_0 = arith.constant 0 : i32
    %c0_i32_1 = arith.constant 0 : i32
    return %arg0, %c0_i32, %c0_i32_0 : i32, i32, i32
  }
}

</mosaic_0001>

<bundles_post_ra>
// kernel: tpu_custom_call.1
= control target key start
LH: loop header
LB: loop body
LE: loop exit
PB: predicated region body
PF: predicated region fallthrough
CT: control target
= control target key end

     0   :  { %8 = vsyncpa [#allocation3], 0  ;;  %s1970_s0 = inlined_call_operand.hbm [shape: f32[2,4,256], index: 0, kind: input, shape index: {}]   ;;  %s1971_s1 = inlined_call_operand.hbm [shape: f32[4,4], index: 1, kind: input, shape index: {}]   ;;  %s1972_s2 = inlined_call_operand.hbm [shape: bf16[256,1024], index: 2, kind: input, shape index: {}]   ;;  %s1973_s3 = inlined_call_operand.hbm [shape: f32[2,4,1024], index: 3, kind: output, shape index: {}]  }
   0x1   :  { %10 = vsyncpa [#allocation3 + $0x1], 0 }
   0x2   :  { %11 = vsyncpa [#allocation6], 0 }
   0x3   :  { %12 = vsyncpa [#allocation4], 0 }
   0x4   :  { %14 = vsyncpa [#allocation4 + $0x1], 0  ;;  %s1739_s12 = smov 0   ;;  %s1741_s13 = smov 0  }
   0x5   :  { %s1743_s14 = smov 0   ;;  %s1745_s15 = smov 0  }
   0x6 LB: > { %s1760_s16 = sadd.s32 4294967295, %s1710_s15   ;;  %s1333_s17 = sadd.s32 4294967294, %s1710_s15   ;;  %s1710_s15 = sphi %s1745_s15, %s1993_s15   ;;  %s1706_s14 = sphi %s1743_s14, %s1992_s14   ;;  %s1702_s13 = sphi %s1741_s13, %s1991_s13   ;;  %s1698_s12 = sphi %s1739_s12, %s1990_s12  }
   0x7   : > { %p40_p0 = scmp.ne.s32.totalorder %s1702_s13, %s1698_s12  ;;  %p1974_p1 = scmp.eq.s32.totalorder %s1760_s16, 0 }
   0x8   : > { %p112_p3 = scmp.eq.s32.totalorder %s1333_s17, 1  ;;  %p1334_p5 = scmp.ge.s32.totalorder %s1710_s15, 1 }
   0x9   : > { %p1769_p4 = por %p1974_p1, %p40_p0  ;;  %p119_p7 = scmp.lt.s32.totalorder %s1710_s15, 3 }
   0xa   : > { %p1774_p6 = por %p112_p3, %p40_p0  ;;  %s1712_s21 = smov [#allocation5]  }
   0xb   : > { %s1977_s18 = scalar_select %p1769_p4, 1, 0 }
   0xc   : > { %s1978_s19 = scalar_select %p1774_p6, 1, 0 }
   0xd   : > { %p1779_p8 = pnand %p1334_p5, %p119_p7  ;;  %s132_s22 = sshll.u32 %s1712_s21, 4  ;;  %s133_s22 = int_to_ptr.vmem [resolvable:$true] %s132_s22 }
   0xe   : > { %s1713_s23 = smov [#allocation7]   ;;  %s1554_s28 = scalar_lea.hbm %s1971_s1, 64 }
   0xf   : > { %s1979_s20 = scalar_select %p1779_p8, 1, 0 }
  0x10   : > { %p1495_p10 = pneg %p1779_p8  ;;  %s142_s24 = sshll.u32 %s1713_s23, 4  ;;  %s1792_s24 = int_to_ptr.vmem [resolvable:$true] %s142_s24 }
  0x11   : > { %p1555_p12 = scmp.ne.s32.totalorder %s1971_s1, %s1554_s28  ;;  %p1561_p5 = scmp.lt.u32.totalorder %s1554_s28, %s1971_s1 }
  0x12   : > { %p1788_p11 = pnand %p1495_p10, %p1974_p1 }
  0x14   : > { %p1556_p13 = pneg %p1788_p11 }
  0x16   : > { %p1557_p0 = pnand %p1556_p13, %p1555_p12 }
  0x18   : > { %p1558_p3 = pneg %p1557_p0 }
  0x1a   : > { %p1563_p7 = pnand %p1561_p5, %p1558_p3 }
  0x1c   : > { %1566 = shalt.err (!%p1563_p7)
}
  0x1d   : > { %s1567_s6 = scalar_lea.vmem %s133_s22, 64  ;;  %p1575_p2 = scmp.lt.s32.totalorder %s133_s22, %s133_s22 }
  0x1e   : > { %p1568_p10 = scmp.ne.s32.totalorder %s133_s22, %s1567_s6  ;;  %p1576_p6 = scmp.lt.s32.totalorder %s1567_s6, %s1567_s6 }
  0x20   : > { %p1570_p9 = pnand %p1568_p10, %p1556_p13  ;;  %p1577_p4 = por %p1576_p6, %p1575_p2 }
  0x22   : > { %p1571_p1 = pneg %p1570_p9 }
  0x24   : > { %p1578_p8 = pnand %p1577_p4, %p1571_p1 }
  0x26   : > { %1581 = shalt.err (!%p1578_p8)
}
  0x27   : > { %1498 = dma.hbm_to_vmem [thread:$0]  (!%p1788_p11), %s1971_s1, 64, %s133_s22, [#allocation6]  }
  0x28   : > { %s1582_s11 = scalar_lea.hbm %s1972_s2, 16384 }
  0x29   : > { %p1583_p9 = scmp.ne.s32.totalorder %s1972_s2, %s1582_s11  ;;  %p1589_p4 = scmp.lt.u32.totalorder %s1582_s11, %s1972_s2 }
  0x2b   : > { %p1585_p2 = pnand %p1583_p9, %p1556_p13 }
  0x2d   : > { %p1586_p1 = pneg %p1585_p2 }
  0x2f   : > { %p1591_p6 = pnand %p1589_p4, %p1586_p1 }
  0x31   : > { %1594 = shalt.err (!%p1591_p6)
}
  0x32   : > { %s1595_s22 = scalar_lea.vmem %s1792_s24, 16384  ;;  %p1603_p3 = scmp.lt.s32.totalorder %s1792_s24, %s1792_s24 }
  0x33   : > { %p1596_p8 = scmp.ne.s32.totalorder %s1792_s24, %s1595_s22  ;;  %p1604_p5 = scmp.lt.s32.totalorder %s1595_s22, %s1595_s22 }
  0x35   : > { %p1598_p12 = pnand %p1596_p8, %p1556_p13  ;;  %p1605_p7 = por %p1604_p5, %p1603_p3 }
  0x37   : > { %p1599_p0 = pneg %p1598_p12 }
  0x39   : > { %p1606_p10 = pnand %p1605_p7, %p1599_p0 }
  0x3b   : > { %1609 = shalt.err (!%p1606_p10)
}
  0x3c   : > { %s1714_s27 = smov 512   ;;  %s1715_s28 = smov 32  }
  0x3d   : > { %1501 = dma.hbm_to_vmem [thread:$0]  (!%p1788_p11), %s1972_s2, 16384, %s1792_s24, [#allocation6], %s1714_s27, %s1714_s27, %s1715_s28  }
  0x3e   : > { %s1842_s4 = sadd.s32 1, %s1710_s15   ;;  %s27_s5 = sadd.s32 1, %s1706_s14 }
  0x3f   : > { %s24_s6 = ssub.s32 %s1710_s15, %s1842_s4  ;;  %p34_p13 = scmp.ne.s32.totalorder %s1706_s14, %s1702_s13 }
  0x40   : > { %p25_p9 = scmp.eq.s32.totalorder %s24_s6, 0  ;;  %p35_p2 = scmp.eq.s32.totalorder %s1710_s15, 0 }
  0x41   : > { %p1981_p1 = scmp.eq.s32.totalorder %s1760_s16, 1  ;;  %p1512_p6 = scmp.lt.s32.totalorder %s1710_s15, 2 }
  0x42   : > { %s1858_s8 = scalar_select %p25_p9, %s1706_s14, %s27_s5  }
  0x43   : > { %p1852_p4 = por %p1981_p1, %p34_p13  ;;  %p36_p8 = por %p35_p2, %p34_p13 }
  0x44   : > { %s156_s25 = sand.u32 1, %s1706_s14   ;;  %s1481_s24 = sshll.u32 %s1710_s15, 7 }
  0x45   : > { %s1338_s9 = sshll.u32 %s156_s25, 3  ;;  %s1865_s17 = scalar_lea.hbm %s1970_s0, %s1481_s24 }
  0x46   : > { %s160_s21 = scalar_lea.vmem [#allocation2], %s1338_s9  ;;  %p1869_p11 = pnand %p1512_p6, %p36_p8 }
  0x47   : > { %s168_s23 = sshll.u32 %s160_s21, 4  ;;  %s157_s22 = scalar_lea.sflag [#allocation3], %s156_s25  ;;  %s1867_s23 = int_to_ptr.vmem [resolvable:$true] %s168_s23 }
  0x48   : > { %s1610_s27 = scalar_lea.hbm %s1865_s17, 128  ;;  %p1612_p0 = pneg %p1869_p11 }
  0x49   : > { %p1611_p12 = scmp.ne.s32.totalorder %s1865_s17, %s1610_s27  ;;  %s1615_s30 = scalar_lea.hbm %s1970_s0, 256 }
  0x4a   : > { %p1616_p7 = scmp.lt.u32.totalorder %s1865_s17, %s1970_s0  ;;  %p1617_p10 = scmp.lt.u32.totalorder %s1615_s30, %s1610_s27 }
  0x4b   : > { %p1613_p3 = pnand %p1612_p0, %p1611_p12  ;;  %p1619_p9 = scmp.lt.u32.totalorder %s1610_s27, %s1865_s17 }
  0x4c   : > { %p1618_p13 = por %p1617_p10, %p1616_p7 }
  0x4d   : > { %p1614_p5 = pneg %p1613_p3 }
  0x4e   : > { %p1620_p2 = por %p1619_p9, %p1618_p13 }
  0x50   : > { %p1621_p1 = pnand %p1620_p2, %p1614_p5 }
  0x52   : > { %1624 = shalt.err (!%p1621_p1)
}
  0x53   : > { %s1625_s25 = scalar_lea.vmem %s1867_s23, 128  ;;  %s1716_s9 = smov [#allocation2]  }
  0x54   : > { %p1626_p6 = scmp.ne.s32.totalorder %s1867_s23, %s1625_s25  ;;  %s1630_s24 = sshll.u32 %s1716_s9, 4  ;;  %s1631_s24 = int_to_ptr.vmem [resolvable:$false] %s1630_s24 }
  0x55   : > { %s1632_s10 = scalar_lea.vmem %s1631_s24, 256  ;;  %p1633_p3 = scmp.lt.s32.totalorder %s1867_s23, %s1631_s24 }
  0x56   : > { %p1628_p8 = pnand %p1626_p6, %p1612_p0  ;;  %p1634_p7 = scmp.lt.s32.totalorder %s1632_s10, %s1625_s25 }
  0x58   : > { %p1629_p12 = pneg %p1628_p8  ;;  %p1635_p10 = por %p1634_p7, %p1633_p3 }
  0x5a   : > { %p1636_p13 = pnand %p1635_p10, %p1629_p12 }
  0x5c   : > { %1639 = shalt.err (!%p1636_p13)
}
  0x5d   : > { %1505 = dma.hbm_to_vmem [thread:$0]  (!%p1869_p11), %s1865_s17, 128, %s1867_s23, %s157_s22  }
  0x5e   : > { %p1984_p5 = scmp.ne.s32.totalorder %s1979_s20, 0 }
  0x5f   : > { %s1901_s11 = sand.u32 (!%p1984_p5), 1, %s1702_s13   ;;  %p1985_p0 = scmp.ne.s32.totalorder (!%p1984_p5), %s1977_s18, 0 }
  0x60   : > { %177 = sbr.rel (%p1984_p5) target bundleno = 625 (0x271), region = 32  ;;  %s1342_s21 = sshll.u32 (!%p1984_p5), %s1901_s11, 3 }
  0x61   : > { %s180_s27 = scalar_lea.sflag (!%p1984_p5), [#allocation3], %s1901_s11  ;;  %s183_s28 = scalar_lea.vmem (!%p1984_p5), [#allocation2], %s1342_s21 }
  0x67   : > { %1685 = dma.done.wait (%p1985_p0), %s180_s27, 128  }
  0x68   : > { %1687 = vsyncadd (%p1985_p0), %s180_s27, 4294967168  ;;  %p1986_p9 = scmp.eq.s32.totalorder %s1760_s16, 0 }
  0x6a   : > { %1689 = dma.done.wait (%p1986_p9), [#allocation6], 16448   ;;  %p1987_p11 = pmov %p1986_p9 }
  0x6b   : > { %v1717_v0 = vmov 0   ;;  %v215_v1 = vld [vmem:[%s183_s28] sm:$0xff]  ;;  %vm355_vm0 = vcmask 1041408   ;;  %v223_v2 = vld [vmem:[#allocation7] sm:$0xff]  ;;  %v221_v8 = vld [vmem:[#allocation5] sm:$0xf] }
  0x6c   : > { %1691 = vsyncadd (%p1987_p11), [#allocation6], 4294950848  ;;  %394 = vmatprep.mubr.bf16.mxu0 %v1717_v0  ;;  %v217_v3 = vcombine.high %v215_v1, %v215_v1  ;;  %v219_v4 = vpack.c.bf16 %v215_v1, %v215_v1  ;;  %v227_v5 = vld [vmem:[#allocation7 + $0x20] sm:$0xff]  ;;  %v224_v6 = vld [vmem:[#allocation7 + $0x8] sm:$0xff]  ;;  %v222_v21 = vpack.c.bf16 %v221_v8, %v221_v8  ;;  %vm351_vm1 = vcmask 31744   ;;  %s1345_s18 = sshll.u32 %s1901_s11, 5 }
  0x6d   : > { %v228_v7 = vld [vmem:[#allocation7 + $0x28] sm:$0xff]  ;;  %v1349_v9 = vcombine.high %v223_v2, %v227_v5  ;;  %v1348_v10 = vcombine.low %v223_v2, %v227_v5  ;;  %v231_v11 = vld [vmem:[#allocation7 + $0x40] sm:$0xff]  ;;  %s213_s20 = scalar_lea.vmem [#allocation8], %s1345_s18  ;;  %s1482_s17 = sshll.u32 %s1760_s16, 9 }
  0x6e   : > { %v235_v12 = vld [vmem:[#allocation7 + $0x60] sm:$0xff]  ;;  %v220_v13 = vpack.c.bf16 %v217_v3, %v217_v3  ;;  %v357_v14 = vsel %vm355_vm0, %v219_v4, 0  ;;  %v1351_v15 = vcombine.high %v224_v6, %v228_v7  ;;  %v232_v19 = vld [vmem:[#allocation7 + $0x48] sm:$0xff]  ;;  %v1350_v23 = vcombine.low %v224_v6, %v228_v7  ;;  %s1244_s23 = sshll.u32 %s213_s20, 4  ;;  %s1926_s29 = scalar_lea.hbm %s1973_s3, %s1482_s17  ;;  %s1928_s23 = int_to_ptr.vmem [resolvable:$true] %s1244_s23 }
  0x6f   : > { %v1357_v16 = vcombine.high %v231_v11, %v235_v12  ;;  %v239_v17 = vld [vmem:[#allocation7 + $0x80] sm:$0xff]  ;;  %1045 = vmatprep.subr.bf16.mxu1 %v1349_v9  ;;  %v236_v20 = vld [vmem:[#allocation7 + $0x68] sm:$0xff]  ;;  %v1356_v22 = vcombine.low %v231_v11, %v235_v12  ;;  %s1230_s16 = scalar_lea.sflag [#allocation4], %s1901_s11  ;;  %s1640_s30 = scalar_lea.vmem %s1928_s23, 512 }
  0x70   : > { %v243_v18 = vld [vmem:[#allocation7 + $0xa0] sm:$0xff]  ;;  %1346 = vmatprep.subr.msk.bf16.mxu0 %vm355_vm0, %v220_v13  ;;  %1046 = vmatpush1.bf16.msra.mxu1 %v1348_v10  ;;  %v1359_v25 = vcombine.high %v232_v19, %v236_v20  ;;  %v240_v28 = vld [vmem:[#allocation7 + $0x88] sm:$0xff]  ;;  %v1358_v31 = vcombine.low %v232_v19, %v236_v20  ;;  %p1641_p2 = scmp.ne.s32.totalorder %s1928_s23, %s1640_s30  ;;  %s1718_s5 = smov [#allocation8]  }
  0x71   : > { %363 = vmatpush1.bf16.msra.mxu0 %v357_v14  ;;  %1047 = vmatprep.subr.bf16.mxu1 %v1357_v16  ;;  %v1365_v24 = vcombine.high %v239_v17, %v243_v18  ;;  %v247_v26 = vld [vmem:[#allocation7 + $0xc0] sm:$0xff]  ;;  %v244_v29 = vld [vmem:[#allocation7 + $0xa8] sm:$0xff]  ;;  %v1364_v30 = vcombine.low %v239_v17, %v243_v18  ;;  %s1644_s6 = sshll.u32 %s1718_s5, 4  ;;  %s1645_s6 = int_to_ptr.vmem [resolvable:$false] %s1644_s6 }
  0x72   : > { %1086 = vmatprep.subr.bf16.mxu0 %v1351_v15  ;;  %v251_v27 = vld [vmem:[#allocation7 + $0xe0] sm:$0xff]  ;;  %v1367_v33 = vcombine.high %v240_v28, %v244_v29  ;;  %v248_v36 = vld [vmem:[#allocation7 + $0xc8] sm:$0xff]  ;;  %v1366_v39 = vcombine.low %v240_v28, %v244_v29  ;;  %p1642_p1 = pnand %p1641_p2, %p1852_p4  ;;  %s1646_s25 = scalar_lea.vmem %s1645_s6, 1024 }
  0x73   : > { %v1373_v32 = vcombine.high %v247_v26, %v251_v27  ;;  %v255_v34 = vld [vmem:[#allocation7 + $0x100] sm:$0xff]  ;;  %v252_v37 = vld [vmem:[#allocation7 + $0xe8] sm:$0xff]  ;;  %v1372_v38 = vcombine.low %v247_v26, %v251_v27  ;;  %p1647_p8 = scmp.lt.s32.totalorder %s1928_s23, %s1645_s6  ;;  %p1648_p12 = scmp.lt.s32.totalorder %s1646_s25, %s1640_s30 }
  0x74   : > { %1347 = vmatmul.mubr.msk.bf16.vlgmr.msra.gmra.mrb[0].mxu0 %vm351_vm1, %v222_v21  ;;  %1048 = vmatpush1.bf16.msra.mxu1 %v1356_v22  ;;  %v259_v35 = vld [vmem:[#allocation7 + $0x120] sm:$0xff]  ;;  %v1375_v41 = vcombine.high %v248_v36, %v252_v37  ;;  %v256_v44 = vld [vmem:[#allocation7 + $0x108] sm:$0xff]  ;;  %v1374_v47 = vcombine.low %v248_v36, %v252_v37  ;;  %p1643_p6 = pneg %p1642_p1 }
  0x75   : > { %1087 = vmatpush1.bf16.msra.mxu0 %v1350_v23  ;;  %1049 = vmatprep.subr.bf16.mxu1 %v1365_v24  ;;  %v1381_v40 = vcombine.high %v255_v34, %v259_v35  ;;  %v263_v42 = vld [vmem:[#allocation7 + $0x140] sm:$0xff]  ;;  %v260_v45 = vld [vmem:[#allocation7 + $0x128] sm:$0xff]  ;;  %v1380_v46 = vcombine.low %v255_v34, %v259_v35  ;;  %p1649_p3 = por %p1648_p12, %p1647_p8 }
  0x76   : > { %1088 = vmatprep.subr.bf16.mxu0 %v1359_v25  ;;  %v267_v43 = vld [vmem:[#allocation7 + $0x160] sm:$0xff]  ;;  %v1383_v49 = vcombine.high %v256_v44, %v260_v45  ;;  %v264_v52 = vld [vmem:[#allocation7 + $0x148] sm:$0xff]  ;;  %v1382_v55 = vcombine.low %v256_v44, %v260_v45 }
  0x77   : > { %v1389_v48 = vcombine.high %v263_v42, %v267_v43  ;;  %v271_v50 = vld [vmem:[#allocation7 + $0x180] sm:$0xff]  ;;  %v268_v53 = vld [vmem:[#allocation7 + $0x168] sm:$0xff]  ;;  %v1388_v54 = vcombine.low %v263_v42, %v267_v43  ;;  %p1650_p7 = pnand %p1649_p3, %p1643_p6 }
  0x78   : > { %1050 = vmatpush1.bf16.msra.mxu1 %v1364_v30  ;;  %v275_v51 = vld [vmem:[#allocation7 + $0x1a0] sm:$0xff]  ;;  %v1391_v57 = vcombine.high %v264_v52, %v268_v53  ;;  %v272_v60 = vld [vmem:[#allocation7 + $0x188] sm:$0xff]  ;;  %v1390_v63 = vcombine.low %v264_v52, %v268_v53 }
  0x79   : > { %1089 = vmatpush1.bf16.msra.mxu0 %v1358_v31  ;;  %1051 = vmatprep.subr.bf16.mxu1 %v1373_v32  ;;  %v1397_v56 = vcombine.high %v271_v50, %v275_v51  ;;  %v279_v58 = vld [vmem:[#allocation7 + $0x1c0] sm:$0xff]  ;;  %v276_v61 = vld [vmem:[#allocation7 + $0x1a8] sm:$0xff]  ;;  %v1396_v62 = vcombine.low %v271_v50, %v275_v51 }
  0x7a   : > { %1090 = vmatprep.subr.bf16.mxu0 %v1367_v33  ;;  %v283_v59 = vld [vmem:[#allocation7 + $0x1e0] sm:$0xff]  ;;  %v1399_v1 = vcombine.high %v272_v60, %v276_v61  ;;  %v280_v4 = vld [vmem:[#allocation7 + $0x1c8] sm:$0xff]  ;;  %v1398_v7 = vcombine.low %v272_v60, %v276_v61 }
  0x7b   : > { %v1405_v0 = vcombine.high %v279_v58, %v283_v59  ;;  %v287_v2 = vld [vmem:[#allocation7 + $0x200] sm:$0xff]  ;;  %v284_v5 = vld [vmem:[#allocation7 + $0x1e8] sm:$0xff]  ;;  %v1404_v6 = vcombine.low %v279_v58, %v283_v59 }
  0x7c   : > { %1052 = vmatpush1.bf16.msra.mxu1 %v1372_v38  ;;  %v291_v3 = vld [vmem:[#allocation7 + $0x220] sm:$0xff]  ;;  %v1407_v9 = vcombine.high %v280_v4, %v284_v5  ;;  %v288_v12 = vld [vmem:[#allocation7 + $0x208] sm:$0xff]  ;;  %v1406_v15 = vcombine.low %v280_v4, %v284_v5 }
  0x7d   : > { %1091 = vmatpush1.bf16.msra.mxu0 %v1366_v39  ;;  %1053 = vmatprep.subr.bf16.mxu1 %v1381_v40  ;;  %v1413_v8 = vcombine.high %v287_v2, %v291_v3  ;;  %v295_v10 = vld [vmem:[#allocation7 + $0x240] sm:$0xff]  ;;  %v292_v13 = vld [vmem:[#allocation7 + $0x228] sm:$0xff]  ;;  %v1412_v14 = vcombine.low %v287_v2, %v291_v3 }
  0x7e   : > { %1092 = vmatprep.subr.bf16.mxu0 %v1375_v41  ;;  %v299_v11 = vld [vmem:[#allocation7 + $0x260] sm:$0xff]  ;;  %v1415_v17 = vcombine.high %v288_v12, %v292_v13  ;;  %v296_v20 = vld [vmem:[#allocation7 + $0x248] sm:$0xff]  ;;  %v1414_v23 = vcombine.low %v288_v12, %v292_v13  ;;  %v230_v12 = vld [vmem:[#allocation7 + $0x38] sm:$0xff] }
  0x7f   : > { %v1421_v16 = vcombine.high %v295_v10, %v299_v11  ;;  %v303_v18 = vld [vmem:[#allocation7 + $0x280] sm:$0xff]  ;;  %v300_v21 = vld [vmem:[#allocation7 + $0x268] sm:$0xff]  ;;  %v1420_v22 = vcombine.low %v295_v10, %v299_v11  ;;  %v226_v10 = vld [vmem:[#allocation7 + $0x18] sm:$0xff] }
  0x80   : > { %1054 = vmatpush1.bf16.msra.mxu1 %v1380_v46  ;;  %v307_v19 = vld [vmem:[#allocation7 + $0x2a0] sm:$0xff]  ;;  %v1423_v25 = vcombine.high %v296_v20, %v300_v21  ;;  %v304_v28 = vld [vmem:[#allocation7 + $0x288] sm:$0xff]  ;;  %v1422_v31 = vcombine.low %v296_v20, %v300_v21  ;;  %v234_v20 = vld [vmem:[#allocation7 + $0x58] sm:$0xff] }
  0x81   : > { %1093 = vmatpush1.bf16.msra.mxu0 %v1374_v47  ;;  %1055 = vmatprep.subr.bf16.mxu1 %v1389_v48  ;;  %v1429_v24 = vcombine.high %v303_v18, %v307_v19  ;;  %v311_v26 = vld [vmem:[#allocation7 + $0x2c0] sm:$0xff]  ;;  %v308_v29 = vld [vmem:[#allocation7 + $0x2a8] sm:$0xff]  ;;  %v1428_v30 = vcombine.low %v303_v18, %v307_v19  ;;  %v237_v19 = vld [vmem:[#allocation7 + $0x70] sm:$0xff] }
  0x82   : > { %1094 = vmatprep.subr.bf16.mxu0 %v1383_v49  ;;  %v315_v27 = vld [vmem:[#allocation7 + $0x2e0] sm:$0xff]  ;;  %v1431_v33 = vcombine.high %v304_v28, %v308_v29  ;;  %v312_v36 = vld [vmem:[#allocation7 + $0x2c8] sm:$0xff]  ;;  %v1430_v39 = vcombine.low %v304_v28, %v308_v29  ;;  %v238_v21 = vld [vmem:[#allocation7 + $0x78] sm:$0xff] }
  0x83   : > { %v1437_v32 = vcombine.high %v311_v26, %v315_v27  ;;  %v319_v34 = vld [vmem:[#allocation7 + $0x300] sm:$0xff]  ;;  %v316_v37 = vld [vmem:[#allocation7 + $0x2e8] sm:$0xff]  ;;  %v1436_v38 = vcombine.low %v311_v26, %v315_v27  ;;  %v241_v26 = vld [vmem:[#allocation7 + $0x90] sm:$0xff]  ;;  %v1363_v28 = vcombine.high %v234_v20, %v238_v21 }
  0x84   : > { %1056 = vmatpush1.bf16.msra.mxu1 %v1388_v54  ;;  %v323_v35 = vld [vmem:[#allocation7 + $0x320] sm:$0xff]  ;;  %v1439_v41 = vcombine.high %v312_v36, %v316_v37  ;;  %v320_v44 = vld [vmem:[#allocation7 + $0x308] sm:$0xff]  ;;  %v1438_v47 = vcombine.low %v312_v36, %v316_v37  ;;  %v245_v29 = vld [vmem:[#allocation7 + $0xb0] sm:$0xff] }
  0x85   : > { %1095 = vmatpush1.bf16.msra.mxu0 %v1382_v55  ;;  %1057 = vmatprep.subr.bf16.mxu1 %v1397_v56  ;;  %v1445_v40 = vcombine.high %v319_v34, %v323_v35  ;;  %v327_v42 = vld [vmem:[#allocation7 + $0x340] sm:$0xff]  ;;  %v324_v45 = vld [vmem:[#allocation7 + $0x328] sm:$0xff]  ;;  %v1444_v46 = vcombine.low %v319_v34, %v323_v35  ;;  %v1369_v34 = vcombine.high %v241_v26, %v245_v29  ;;  %v249_v36 = vld [vmem:[#allocation7 + $0xd0] sm:$0xff] }
  0x86   : > { %1096 = vmatprep.subr.bf16.mxu0 %v1391_v57  ;;  %v331_v43 = vld [vmem:[#allocation7 + $0x360] sm:$0xff]  ;;  %v1447_v49 = vcombine.high %v320_v44, %v324_v45  ;;  %v328_v52 = vld [vmem:[#allocation7 + $0x348] sm:$0xff]  ;;  %v1446_v55 = vcombine.low %v320_v44, %v324_v45  ;;  %v253_v37 = vld [vmem:[#allocation7 + $0xf0] sm:$0xff] }
  0x87   : > { %v1453_v48 = vcombine.high %v327_v42, %v331_v43  ;;  %v335_v50 = vld [vmem:[#allocation7 + $0x380] sm:$0xff]  ;;  %v332_v53 = vld [vmem:[#allocation7 + $0x368] sm:$0xff]  ;;  %v1452_v54 = vcombine.low %v327_v42, %v331_v43  ;;  %v1377_v42 = vcombine.high %v249_v36, %v253_v37  ;;  %v257_v44 = vld [vmem:[#allocation7 + $0x110] sm:$0xff] }
  0x88   : > { %1058 = vmatpush1.bf16.msra.mxu1 %v1396_v62  ;;  %v339_v51 = vld [vmem:[#allocation7 + $0x3a0] sm:$0xff]  ;;  %v1455_v57 = vcombine.high %v328_v52, %v332_v53  ;;  %v336_v58 = vld [vmem:[#allocation7 + $0x388] sm:$0xff]  ;;  %v1454_v61 = vcombine.low %v328_v52, %v332_v53  ;;  %v261_v45 = vld [vmem:[#allocation7 + $0x130] sm:$0xff] }
  0x89   : > { %1097 = vmatpush1.bf16.msra.mxu0 %v1390_v63  ;;  %1059 = vmatprep.subr.bf16.mxu1 %v1405_v0  ;;  %v1461_v56 = vcombine.high %v335_v50, %v339_v51  ;;  %v340_v59 = vld [vmem:[#allocation7 + $0x3a8] sm:$0xff]  ;;  %v1460_v60 = vcombine.low %v335_v50, %v339_v51  ;;  %v343_v0 = vld [vmem:[#allocation7 + $0x3c0] sm:$0xff]  ;;  %v1385_v50 = vcombine.high %v257_v44, %v261_v45  ;;  %v265_v52 = vld [vmem:[#allocation7 + $0x150] sm:$0xff] }
  0x8a   : > { %1098 = vmatprep.subr.bf16.mxu0 %v1399_v1  ;;  %v1463_v62 = vcombine.high %v336_v58, %v340_v59  ;;  %v1462_v63 = vcombine.low %v336_v58, %v340_v59  ;;  %v347_v1 = vld [vmem:[#allocation7 + $0x3e0] sm:$0xff]  ;;  %v344_v2 = vld [vmem:[#allocation7 + $0x3c8] sm:$0xff]  ;;  %v269_v53 = vld [vmem:[#allocation7 + $0x170] sm:$0xff] }
  0x8b   : > { %v1469_v3 = vcombine.high %v343_v0, %v347_v1  ;;  %v348_v4 = vld [vmem:[#allocation7 + $0x3e8] sm:$0xff]  ;;  %v1393_v58 = vcombine.high %v265_v52, %v269_v53 }
  0x8c   : > { %1060 = vmatpush1.bf16.msra.mxu1 %v1404_v6  ;;  %v1470_v5 = vcombine.low %v344_v2, %v348_v4  ;;  %v1471_v6 = vcombine.high %v344_v2, %v348_v4  ;;  %v281_v4 = vld [vmem:[#allocation7 + $0x1d0] sm:$0xff] }
  0x8d   : > { %1099 = vmatpush1.bf16.msra.mxu0 %v1398_v7  ;;  %1061 = vmatprep.subr.bf16.mxu1 %v1413_v8  ;;  %v1468_v7 = vcombine.low %v343_v0, %v347_v1  ;;  %v225_v8 = vld [vmem:[#allocation7 + $0x10] sm:$0xff]  ;;  %v1392_v0 = vcombine.low %v265_v52, %v269_v53 }
  0x8e   : > { %1100 = vmatprep.subr.bf16.mxu0 %v1407_v9  ;;  %v229_v9 = vld [vmem:[#allocation7 + $0x30] sm:$0xff] }
  0x8f   : > { %v1353_v11 = vcombine.high %v225_v8, %v229_v9  ;;  %v1352_v13 = vcombine.low %v225_v8, %v229_v9  ;;  %v329_v53 = vld [vmem:[#allocation7 + $0x350] sm:$0xff] }
  0x90   : > { %1062 = vmatpush1.bf16.msra.mxu1 %v1412_v14  ;;  %v1354_v14 = vcombine.low %v226_v10, %v230_v12 }
  0x91   : > { %1101 = vmatpush1.bf16.msra.mxu0 %v1406_v15  ;;  %1063 = vmatprep.subr.bf16.mxu1 %v1421_v16  ;;  %v1355_v15 = vcombine.high %v226_v10, %v230_v12  ;;  %v289_v12 = vld [vmem:[#allocation7 + $0x210] sm:$0xff] }
  0x92   : > { %1102 = vmatprep.subr.bf16.mxu0 %v1415_v17  ;;  %v233_v17 = vld [vmem:[#allocation7 + $0x50] sm:$0xff] }
  0x93   : > { %v1361_v27 = vcombine.high %v233_v17, %v237_v19 }
  0x94   : > { %1064 = vmatpush1.bf16.msra.mxu1 %v1420_v22 }
  0x95   : > { %1103 = vmatpush1.bf16.msra.mxu0 %v1414_v23  ;;  %1065 = vmatprep.subr.bf16.mxu1 %v1429_v24 }
  0x96   : > { %1104 = vmatprep.subr.bf16.mxu0 %v1423_v25 }
  0x98   : > { %1066 = vmatpush1.bf16.msra.mxu1 %v1428_v30  ;;  %v242_v30 = vld [vmem:[#allocation7 + $0x98] sm:$0xff] }
  0x99   : > { %1105 = vmatpush1.bf16.msra.mxu0 %v1422_v31  ;;  %1067 = vmatprep.subr.bf16.mxu1 %v1437_v32  ;;  %v246_v31 = vld [vmem:[#allocation7 + $0xb8] sm:$0xff]  ;;  %v1360_v32 = vcombine.low %v233_v17, %v237_v19 }
  0x9a   : > { %1106 = vmatprep.subr.bf16.mxu0 %v1431_v33  ;;  %v1362_v33 = vcombine.low %v234_v20, %v238_v21  ;;  %v1371_v35 = vcombine.high %v242_v30, %v246_v31  ;;  %v297_v20 = vld [vmem:[#allocation7 + $0x250] sm:$0xff] }
  0x9b   : > { %v301_v21 = vld [vmem:[#allocation7 + $0x270] sm:$0xff] }
  0x9c   : > { %1068 = vmatpush1.bf16.msra.mxu1 %v1436_v38  ;;  %v250_v38 = vld [vmem:[#allocation7 + $0xd8] sm:$0xff] }
  0x9d   : > { %1107 = vmatpush1.bf16.msra.mxu0 %v1430_v39  ;;  %1069 = vmatprep.subr.bf16.mxu1 %v1445_v40  ;;  %v254_v39 = vld [vmem:[#allocation7 + $0xf8] sm:$0xff]  ;;  %v1368_v40 = vcombine.low %v241_v26, %v245_v29  ;;  %v305_v29 = vld [vmem:[#allocation7 + $0x290] sm:$0xff] }
  0x9e   : > { %1108 = vmatprep.subr.bf16.mxu0 %v1439_v41  ;;  %v1370_v41 = vcombine.low %v242_v30, %v246_v31  ;;  %v1379_v43 = vcombine.high %v250_v38, %v254_v39  ;;  %v309_v30 = vld [vmem:[#allocation7 + $0x2b0] sm:$0xff]  ;;  %v306_v31 = vld [vmem:[#allocation7 + $0x298] sm:$0xff] }
  0xa0   : > { %1070 = vmatpush1.bf16.msra.mxu1 %v1444_v46  ;;  %v258_v46 = vld [vmem:[#allocation7 + $0x118] sm:$0xff] }
  0xa1   : > { %1109 = vmatpush1.bf16.msra.mxu0 %v1438_v47  ;;  %1071 = vmatprep.subr.bf16.mxu1 %v1453_v48  ;;  %v262_v47 = vld [vmem:[#allocation7 + $0x138] sm:$0xff]  ;;  %v1376_v48 = vcombine.low %v249_v36, %v253_v37  ;;  %v313_v37 = vld [vmem:[#allocation7 + $0x2d0] sm:$0xff] }
  0xa2   : > { %1110 = vmatprep.subr.bf16.mxu0 %v1447_v49  ;;  %v1378_v49 = vcombine.low %v250_v38, %v254_v39  ;;  %v1387_v51 = vcombine.high %v258_v46, %v262_v47  ;;  %v317_v38 = vld [vmem:[#allocation7 + $0x2f0] sm:$0xff]  ;;  %v314_v39 = vld [vmem:[#allocation7 + $0x2d8] sm:$0xff] }
  0xa4   : > { %1072 = vmatpush1.bf16.msra.mxu1 %v1452_v54  ;;  %v266_v54 = vld [vmem:[#allocation7 + $0x158] sm:$0xff] }
  0xa5   : > { %1111 = vmatpush1.bf16.msra.mxu0 %v1446_v55  ;;  %1073 = vmatprep.subr.bf16.mxu1 %v1461_v56  ;;  %v270_v55 = vld [vmem:[#allocation7 + $0x178] sm:$0xff]  ;;  %v1384_v56 = vcombine.low %v257_v44, %v261_v45  ;;  %v321_v45 = vld [vmem:[#allocation7 + $0x310] sm:$0xff] }
  0xa6   : > { %1112 = vmatprep.subr.bf16.mxu0 %v1455_v57  ;;  %v1386_v57 = vcombine.low %v258_v46, %v262_v47  ;;  %v1395_v59 = vcombine.high %v266_v54, %v270_v55  ;;  %v1394_v1 = vcombine.low %v266_v54, %v270_v55  ;;  %v325_v46 = vld [vmem:[#allocation7 + $0x330] sm:$0xff]  ;;  %v322_v47 = vld [vmem:[#allocation7 + $0x318] sm:$0xff] }
  0xa7   : > { %v333_v54 = vld [vmem:[#allocation7 + $0x370] sm:$0xff]  ;;  %v330_v55 = vld [vmem:[#allocation7 + $0x358] sm:$0xff] }
  0xa8   : > { %1074 = vmatpush1.bf16.msra.mxu1 %v1460_v60  ;;  %v273_v60 = vld [vmem:[#allocation7 + $0x190] sm:$0xff] }
  0xa9   : > { %1113 = vmatpush1.bf16.msra.mxu0 %v1454_v61  ;;  %1075 = vmatprep.subr.bf16.mxu1 %v1469_v3  ;;  %v277_v61 = vld [vmem:[#allocation7 + $0x1b0] sm:$0xff] }
  0xaa   : > { %1114 = vmatprep.subr.bf16.mxu0 %v1463_v62  ;;  %v274_v62 = vld [vmem:[#allocation7 + $0x198] sm:$0xff]  ;;  %v1401_v2 = vcombine.high %v273_v60, %v277_v61  ;;  %v1400_v8 = vcombine.low %v273_v60, %v277_v61  ;;  %v337_v61 = vld [vmem:[#allocation7 + $0x390] sm:$0xff] }
  0xac   : > { %1076 = vmatpush1.bf16.msra.mxu1 %v1468_v7  ;;  %v286_v7 = vld [vmem:[#allocation7 + $0x1f8] sm:$0xff] }
  0xad   : > { %1115 = vmatpush1.bf16.msra.mxu0 %v1462_v63  ;;  %1127 = vmatprep.subr.bf16.mxu1 %v1353_v11  ;;  %v278_v63 = vld [vmem:[#allocation7 + $0x1b8] sm:$0xff] }
  0xae   : > { %1116 = vmatprep.subr.bf16.mxu0 %v1471_v6  ;;  %v1403_v3 = vcombine.high %v274_v62, %v278_v63  ;;  %v282_v6 = vld [vmem:[#allocation7 + $0x1d8] sm:$0xff]  ;;  %v1402_v9 = vcombine.low %v274_v62, %v278_v63  ;;  %v341_v62 = vld [vmem:[#allocation7 + $0x3b0] sm:$0xff] }
  0xaf   : > { %v1411_v11 = vcombine.high %v282_v6, %v286_v7  ;;  %v1410_v17 = vcombine.low %v282_v6, %v286_v7  ;;  %v338_v63 = vld [vmem:[#allocation7 + $0x398] sm:$0xff]  ;;  %v349_v6 = vld [vmem:[#allocation7 + $0x3f0] sm:$0xff] }
  0xb0   : > { %v346_v7 = vld [vmem:[#allocation7 + $0x3d8] sm:$0xff] }
  0xb1   : > { %1117 = vmatpush1.bf16.msra.mxu0 %v1470_v5  ;;  %v285_v5 = vld [vmem:[#allocation7 + $0x1f0] sm:$0xff] }
  0xb2   : > { %1168 = vmatprep.subr.bf16.mxu0 %v1355_v15  ;;  %v1409_v10 = vcombine.high %v281_v4, %v285_v5  ;;  %v294_v15 = vld [vmem:[#allocation7 + $0x238] sm:$0xff] }
 0x147   : > { %v396_v16 = vpop.f32.mrb[0].mxu0 }
 0x148   : > { %v398_v18 = vpop.f32.mrb[1].mxu0  ;;  %v1915_v24 = vpack.c.bf16 %v396_v16, %v396_v16  ;;  %v1408_v16 = vcombine.low %v281_v4, %v285_v5  ;;  %v345_v5 = vld [vmem:[#allocation7 + $0x3d0] sm:$0xff] }
 0x149   : > { %v404_v22 = vpack.c.bf16 %v398_v18, %v398_v18  ;;  %v400_v23 = vpop.f32.mrb[2].mxu0 }
 0x14a   : > { %v401_v25 = vpop.f32.mrb[3].mxu0  ;;  %v302_v23 = vld [vmem:[#allocation7 + $0x278] sm:$0xff] }
 0x14b   : > { %1077 = vmatprep.mubr.bf16.mxu1 %v404_v22  ;;  %1118 = vmatprep.mubr.bf16.mxu0 %v404_v22 }
 0x14c   : > { %1078 = vmatmul.mubr.bf16.vlgmr.msra.gmra.mrb[0].mxu1 %v1915_v24  ;;  %1119 = vmatmul.mubr.bf16.vlgmr.msra.gmra.mrb[4].mxu0 %v1915_v24 }
 0x14d   : > { %1128 = vmatpush1.bf16.msra.mxu1 %v1352_v13  ;;  %1169 = vmatpush1.bf16.msra.mxu0 %v1354_v14  ;;  %v293_v13 = vld [vmem:[#allocation7 + $0x230] sm:$0xff]  ;;  %v290_v14 = vld [vmem:[#allocation7 + $0x218] sm:$0xff] }
 0x14e   : > { %1159 = vmatprep.mubr.bf16.mxu1 %v404_v22  ;;  %1200 = vmatprep.mubr.bf16.mxu0 %v404_v22  ;;  %v1417_v18 = vcombine.high %v289_v12, %v293_v13  ;;  %v1419_v19 = vcombine.high %v290_v14, %v294_v15  ;;  %v298_v22 = vld [vmem:[#allocation7 + $0x258] sm:$0xff]  ;;  %v1416_v25 = vcombine.low %v289_v12, %v293_v13 }
 0x14f   : > { %1129 = vmatprep.subr.bf16.mxu1 %v1361_v27  ;;  %1170 = vmatprep.subr.bf16.mxu0 %v1363_v28  ;;  %v1418_v26 = vcombine.low %v290_v14, %v294_v15  ;;  %v1425_v27 = vcombine.high %v297_v20, %v301_v21  ;;  %v1427_v28 = vcombine.high %v298_v22, %v302_v23 }
 0x150   : > { %v1472_v13 = vcombine.low %v345_v5, %v349_v6 }
 0x151   : > { %1130 = vmatpush1.bf16.msra.mxu1 %v1360_v32  ;;  %1171 = vmatpush1.bf16.msra.mxu0 %v1362_v33  ;;  %v310_v32 = vld [vmem:[#allocation7 + $0x2b8] sm:$0xff]  ;;  %v1424_v33 = vcombine.low %v297_v20, %v301_v21 }
 0x152   : > { %1131 = vmatprep.subr.bf16.mxu1 %v1369_v34  ;;  %1172 = vmatprep.subr.bf16.mxu0 %v1371_v35  ;;  %v1426_v34 = vcombine.low %v298_v22, %v302_v23  ;;  %v1433_v35 = vcombine.high %v305_v29, %v309_v30  ;;  %v1435_v36 = vcombine.high %v306_v31, %v310_v32 }
 0x155   : > { %1132 = vmatpush1.bf16.msra.mxu1 %v1368_v40  ;;  %1173 = vmatpush1.bf16.msra.mxu0 %v1370_v41  ;;  %v318_v40 = vld [vmem:[#allocation7 + $0x2f8] sm:$0xff]  ;;  %v1432_v41 = vcombine.low %v305_v29, %v309_v30 }
 0x156   : > { %1133 = vmatprep.subr.bf16.mxu1 %v1377_v42  ;;  %1174 = vmatprep.subr.bf16.mxu0 %v1379_v43  ;;  %v1434_v42 = vcombine.low %v306_v31, %v310_v32  ;;  %v1441_v43 = vcombine.high %v313_v37, %v317_v38  ;;  %v1443_v44 = vcombine.high %v314_v39, %v318_v40 }
 0x159   : > { %1134 = vmatpush1.bf16.msra.mxu1 %v1376_v48  ;;  %1175 = vmatpush1.bf16.msra.mxu0 %v1378_v49  ;;  %v326_v48 = vld [vmem:[#allocation7 + $0x338] sm:$0xff]  ;;  %v1440_v49 = vcombine.low %v313_v37, %v317_v38 }
 0x15a   : > { %1135 = vmatprep.subr.bf16.mxu1 %v1385_v50  ;;  %1176 = vmatprep.subr.bf16.mxu0 %v1387_v51  ;;  %v1442_v50 = vcombine.low %v314_v39, %v318_v40  ;;  %v1449_v51 = vcombine.high %v321_v45, %v325_v46  ;;  %v1451_v52 = vcombine.high %v322_v47, %v326_v48 }
 0x15d   : > { %1136 = vmatpush1.bf16.msra.mxu1 %v1384_v56  ;;  %1177 = vmatpush1.bf16.msra.mxu0 %v1386_v57  ;;  %v334_v56 = vld [vmem:[#allocation7 + $0x378] sm:$0xff]  ;;  %v1448_v57 = vcombine.low %v321_v45, %v325_v46 }
 0x15e   : > { %1137 = vmatprep.subr.bf16.mxu1 %v1393_v58  ;;  %1178 = vmatprep.subr.bf16.mxu0 %v1395_v59  ;;  %v1450_v58 = vcombine.low %v322_v47, %v326_v48  ;;  %v1457_v59 = vcombine.high %v329_v53, %v333_v54  ;;  %v1459_v60 = vcombine.high %v330_v55, %v334_v56 }
 0x161   : > { %1138 = vmatpush1.bf16.msra.mxu1 %v1392_v0  ;;  %1179 = vmatpush1.bf16.msra.mxu0 %v1394_v1  ;;  %v342_v0 = vld [vmem:[#allocation7 + $0x3b8] sm:$0xff]  ;;  %v1456_v1 = vcombine.low %v329_v53, %v333_v54 }
 0x162   : > { %1139 = vmatprep.subr.bf16.mxu1 %v1401_v2  ;;  %1180 = vmatprep.subr.bf16.mxu0 %v1403_v3  ;;  %v1458_v2 = vcombine.low %v330_v55, %v334_v56  ;;  %v1465_v3 = vcombine.high %v337_v61, %v341_v62  ;;  %v1467_v4 = vcombine.high %v338_v63, %v342_v0 }
 0x165   : > { %1140 = vmatpush1.bf16.msra.mxu1 %v1400_v8  ;;  %1181 = vmatpush1.bf16.msra.mxu0 %v1402_v9  ;;  %v350_v8 = vld [vmem:[#allocation7 + $0x3f8] sm:$0xff]  ;;  %v1464_v9 = vcombine.low %v337_v61, %v341_v62 }
 0x166   : > { %1141 = vmatprep.subr.bf16.mxu1 %v1409_v10  ;;  %1182 = vmatprep.subr.bf16.mxu0 %v1411_v11  ;;  %v1466_v10 = vcombine.low %v338_v63, %v342_v0  ;;  %v1473_v11 = vcombine.high %v345_v5, %v349_v6  ;;  %v1475_v12 = vcombine.high %v346_v7, %v350_v8 }
 0x167   : > { %v1474_v14 = vcombine.low %v346_v7, %v350_v8 }
 0x169   : > { %1142 = vmatpush1.bf16.msra.mxu1 %v1408_v16  ;;  %1183 = vmatpush1.bf16.msra.mxu0 %v1410_v17 }
 0x16a   : > { %1143 = vmatprep.subr.bf16.mxu1 %v1417_v18  ;;  %1184 = vmatprep.subr.bf16.mxu0 %v1419_v19 }
 0x16d   : > { %1144 = vmatpush1.bf16.msra.mxu1 %v1416_v25  ;;  %1185 = vmatpush1.bf16.msra.mxu0 %v1418_v26 }
 0x16e   : > { %1145 = vmatprep.subr.bf16.mxu1 %v1425_v27  ;;  %1186 = vmatprep.subr.bf16.mxu0 %v1427_v28 }
 0x171   : > { %1146 = vmatpush1.bf16.msra.mxu1 %v1424_v33  ;;  %1187 = vmatpush1.bf16.msra.mxu0 %v1426_v34 }
 0x172   : > { %1147 = vmatprep.subr.bf16.mxu1 %v1433_v35  ;;  %1188 = vmatprep.subr.bf16.mxu0 %v1435_v36 }
 0x175   : > { %1148 = vmatpush1.bf16.msra.mxu1 %v1432_v41  ;;  %1189 = vmatpush1.bf16.msra.mxu0 %v1434_v42 }
 0x176   : > { %1149 = vmatprep.subr.bf16.mxu1 %v1441_v43  ;;  %1190 = vmatprep.subr.bf16.mxu0 %v1443_v44 }
 0x179   : > { %1150 = vmatpush1.bf16.msra.mxu1 %v1440_v49  ;;  %1191 = vmatpush1.bf16.msra.mxu0 %v1442_v50 }
 0x17a   : > { %1151 = vmatprep.subr.bf16.mxu1 %v1449_v51  ;;  %1192 = vmatprep.subr.bf16.mxu0 %v1451_v52 }
 0x17d   : > { %1152 = vmatpush1.bf16.msra.mxu1 %v1448_v57  ;;  %1193 = vmatpush1.bf16.msra.mxu0 %v1450_v58 }
 0x17e   : > { %1153 = vmatprep.subr.bf16.mxu1 %v1457_v59  ;;  %1194 = vmatprep.subr.bf16.mxu0 %v1459_v60 }
 0x181   : > { %1154 = vmatpush1.bf16.msra.mxu1 %v1456_v1  ;;  %1195 = vmatpush1.bf16.msra.mxu0 %v1458_v2 }
 0x182   : > { %1155 = vmatprep.subr.bf16.mxu1 %v1465_v3  ;;  %1196 = vmatprep.subr.bf16.mxu0 %v1467_v4 }
 0x185   : > { %1156 = vmatpush1.bf16.msra.mxu1 %v1464_v9  ;;  %1197 = vmatpush1.bf16.msra.mxu0 %v1466_v10 }
 0x186   : > { %1157 = vmatprep.subr.bf16.mxu1 %v1473_v11  ;;  %1198 = vmatprep.subr.bf16.mxu0 %v1475_v12 }
 0x189   : > { %1158 = vmatpush1.bf16.msra.mxu1 %v1472_v13  ;;  %1199 = vmatpush1.bf16.msra.mxu0 %v1474_v14 }
 0x18c   : > { %1160 = vmatmul.mubr.bf16.vlgmr.msra.gmra.mrb[4].mxu1 %v1915_v24  ;;  %1201 = vmatmul.mubr.bf16.vlgmr.msra.gmra.mrb[8].mxu0 %v1915_v24 }
 0x21f   : > { %v1079_v15 = vpop.f32.mrb[0].mxu1  ;;  %v1120_v16 = vpop.f32.mrb[4].mxu0 }
 0x220   : > { %v1081_v17 = vpop.f32.mrb[1].mxu1  ;;  %v1122_v18 = vpop.f32.mrb[5].mxu0 }
 0x221   : > { %v1217_v19 = vcombine.low %v1079_v15, %v1081_v17  ;;  %v1218_v20 = vcombine.low %v1120_v16, %v1122_v18  ;;  %v1083_v21 = vpop.f32.mrb[2].mxu1  ;;  %v1124_v22 = vpop.f32.mrb[6].mxu0 }
 0x222   : > { %v1084_v23 = vpop.f32.mrb[3].mxu1  ;;  %v1125_v25 = vpop.f32.mrb[7].mxu0 }
 0x223   : > { %1225 = vst [vmem:[%s213_s20] sm:$0xff] %v1217_v19  ;;  %1226 = vst [vmem:[%s213_s20 + $0x8] sm:$0xff] %v1218_v20 }
 0x25f   : > { %v1161_v26 = vpop.f32.mrb[4].mxu1  ;;  %v1202_v27 = vpop.f32.mrb[8].mxu0 }
 0x260   : > { %v1163_v24 = vpop.f32.mrb[5].mxu1  ;;  %v1204_v28 = vpop.f32.mrb[9].mxu0 }
 0x261   : > { %v1219_v29 = vcombine.low %v1161_v26, %v1163_v24  ;;  %v1220_v30 = vcombine.low %v1202_v27, %v1204_v28  ;;  %v1165_v31 = vpop.f32.mrb[6].mxu1  ;;  %v1206_v32 = vpop.f32.mrb[10].mxu0 }
 0x262   : > { %v1166_v33 = vpop.f32.mrb[7].mxu1  ;;  %v1207_v34 = vpop.f32.mrb[11].mxu0 }
 0x263   : > { %1227 = vst [vmem:[%s213_s20 + $0x10] sm:$0xff] %v1219_v29  ;;  %1228 = vst [vmem:[%s213_s20 + $0x18] sm:$0xff] %v1220_v30 }
 0x264   : > { %1653 = shalt.err (!%p1650_p7)
}
 0x265   : > { %s1654_s9 = scalar_lea.hbm %s1926_s29, 512  ;;  %s1658_s11 = scalar_lea.hbm %s1973_s3, 1024 }
 0x266   : > { %p1655_p10 = scmp.ne.s32.totalorder %s1926_s29, %s1654_s9  ;;  %p1659_p0 = scmp.lt.u32.totalorder %s1926_s29, %s1973_s3 }
 0x267   : > { %p1660_p9 = scmp.lt.u32.totalorder %s1658_s11, %s1654_s9  ;;  %p1662_p2 = scmp.lt.u32.totalorder %s1654_s9, %s1926_s29 }
 0x268   : > { %p1656_p13 = pnand %p1655_p10, %p1852_p4 }
 0x269   : > { %p1661_p11 = por %p1660_p9, %p1659_p0 }
 0x26a   : > { %p1657_p5 = pneg %p1656_p13 }
 0x26b   : > { %p1663_p1 = por %p1662_p2, %p1661_p11 }
 0x26d   : > { %p1664_p6 = pnand %p1663_p1, %p1657_p5 }
 0x26f   : > { %1667 = shalt.err (!%p1664_p6)
}
 0x270   : > { %1493 = dma.vmem_to_hbm [thread:$0]  (%p1852_p4), %s1928_s23, 512, %s1926_s29, %s1230_s16  }
 0x271 PF: > { %s1256_s28 = sand.u32 1, %s1698_s12   ;;  %p1988_p8 = scmp.ne.s32.totalorder %s1978_s19, 0 }
 0x272   : > { %p1989_p12 = scmp.ge.s32.totalorder %s1710_s15, 2  ;;  %s1257_s18 = scalar_lea.sflag [#allocation4], %s1256_s28 }
 0x274   : > { %p1507_p3 = pnand %p1989_p12, %p1988_p8 }
 0x276   : > { %1693 = dma.done.wait (!%p1507_p3), %s1257_s18, 512  }
 0x277   : > { %1695 = vsyncadd (!%p1507_p3), %s1257_s18, 4294966784  ;;  %p17_p7 = scmp.ge.s32.totalorder %s1842_s4, 4   ;;  %s1990_s12 = smov %s1702_s13 }
 0x278   : > { %s1991_s13 = smov %s1706_s14  ;;  %s1992_s14 = smov %s1858_s8 }
 0x279   : > { %s1993_s15 = smov %s1842_s4  ;;  %19 = sbr.rel (!%p17_p7) target bundleno = 6 (0x6), region = 85 }
 0x280   :  { %1262 = vsyncpa [#allocation3], 1 }
 0x281   :  { %1264 = vsyncpa [#allocation3 + $0x1], 1 }
 0x282   :  { %1265 = vsyncpa [#allocation6], 1 }
 0x283   :  { %1266 = vsyncpa [#allocation4], 1 }
 0x284   :  { %1268 = vsyncpa [#allocation4 + $0x1], 1 }

</bundles_post_ra>
